<compile_context>
chip_gen: v5e
topology: v5e:2x2
jax: 0.10.0
libtpu: 0.0.40
codegen_flags: <defaults>
</compile_context>

<pallas_src>
import jax
import jax.numpy as jnp
from jax.experimental import pallas as pl
from jax.experimental.pallas import tpu as pltpu


def simplefc3_kernel(x_ref, w_ref, b_ref, out_ref):
    """x_ref: (B, P); w_ref: (4, P, P); b_ref: (4, 1, P); out_ref: (B, 3)."""
    x = x_ref[...]

    def layer(h, i):
        # Static leading-axis index -> (P, P) / (1, P) views, f32 MXU accumulate.
        return jnp.dot(h, w_ref[i], preferred_element_type=jnp.float32) + b_ref[i]

    h = jnp.maximum(layer(x, 0), 0.0)
    # TODO(synk): nn.Dropout omitted (identity in eval mode); training-mode RNG
    # masking via pltpu.prng_seed/prng_random_bits not implemented.
    h = jnp.maximum(layer(h, 1), 0.0)
    h = jnp.maximum(layer(h, 2), 0.0)

    # Fused 3-way head: one (P, P) matmul; only the first 3 lanes are real.
    head = layer(h, 3)
    out_ref[...] = head[:, : out_ref.shape[1]]


def prepare_packed_params(params):
    """One-time (init-time) packing: fuse heads and pad/stack all layers into
    a single (4, P, P) weight slab and a (4, 1, P) bias slab."""
    wh = jnp.concatenate([params["wh1"], params["wh2"], params["wh3"]], axis=1)
    bh = jnp.concatenate([params["bh1"], params["bh2"], params["bh3"]], axis=1)

    w_list = [params["w1"], params["w2"], params["w3"], wh]
    b_list = [params["b1"], params["b2"], params["b3"], bh]

    P = max(max(w.shape) for w in w_list)
    P = max(8, ((P + 7) // 8) * 8)  # sublane-friendly

    wpack = jnp.stack(
        [jnp.pad(w, ((0, P - w.shape[0]), (0, P - w.shape[1]))) for w in w_list]
    )
    bpack = jnp.stack([jnp.pad(b, ((0, 0), (0, P - b.shape[1]))) for b in b_list])
    return wpack, bpack


@jax.jit
def simplefc3_forward(x, wpack, bpack):
    """x: (B, S, D). wpack: (4, P, P). bpack: (4, 1, P). Returns 3x (B, 1)."""
    B = x.shape[0]
    x2d = x.reshape(B, -1)  # == x.view(B, -1)
    P = wpack.shape[1]
    if x2d.shape[1] < P:
        x2d = jnp.pad(x2d, ((0, 0), (0, P - x2d.shape[1])))

    n_layers = wpack.shape[0]
    flops = 2 * B * P * P * n_layers
    bytes_accessed = 4 * (x2d.size + wpack.size + bpack.size + B * 3)
    cost = pl.CostEstimate(
        flops=flops, transcendentals=0, bytes_accessed=bytes_accessed)

    vmem = pl.BlockSpec(memory_space=pltpu.MemorySpace.VMEM)

    out = pl.pallas_call(
        simplefc3_kernel,
        out_shape=jax.ShapeDtypeStruct((B, 3), jnp.float32),
        in_specs=[vmem, vmem, vmem],
        out_specs=vmem,
        cost_estimate=cost,
    )(x2d, wpack, bpack)

    # Split packed (B, 3) back into the module's three (B, 1) heads (fused
    # under the same jit, so no extra dispatches).
    return out[:, 0:1], out[:, 1:2], out[:, 2:3]


def init_params(key, in_dim, d_inner, d_inner2, d_inner3):
    """Deterministic synthetic init. Weights stored (in, out); biases (1, out)."""
    dims = [
        ("1", in_dim, d_inner),
        ("2", d_inner, d_inner2),
        ("3", d_inner2, d_inner3),
        ("h1", d_inner3, 1),
        ("h2", d_inner3, 1),
        ("h3", d_inner3, 1),
    ]
    params = {}
    for name, din, dout in dims:
        key, kw, kb = jax.random.split(key, 3)
        bound = 1.0 / (din ** 0.5)  # matches nn.Linear default uniform bound
        params[f"w{name}"] = jax.random.uniform(
            kw, (din, dout), jnp.float32, -bound, bound)
        params[f"b{name}"] = jax.random.uniform(
            kb, (1, dout), jnp.float32, -bound, bound)
    return params


def reference_forward(x, params):
    h = x.reshape(x.shape[0], -1)
    h = jnp.maximum(h @ params["w1"] + params["b1"], 0.0)
    h = jnp.maximum(h @ params["w2"] + params["b2"], 0.0)
    h = jnp.maximum(h @ params["w3"] + params["b3"], 0.0)
    return (h @ params["wh1"] + params["bh1"],
            h @ params["wh2"] + params["bh2"],
            h @ params["wh3"] + params["bh3"])


if __name__ == "__main__":
    # opt: n_max_seq=8, d_model=4, d_inner=32, d_inner2=32, d_inner3=16,
    #      dropout=0.1 (identity in eval)
    B, S, D = 2, 8, 4
    d_inner, d_inner2, d_inner3 = 32, 32, 16

    key = jax.random.PRNGKey(0)
    key, kx = jax.random.split(key)
    x = jax.random.normal(kx, (B, S, D), jnp.float32)

    params = init_params(key, S * D, d_inner, d_inner2, d_inner3)

    # One-time packing (hoisted out of the per-call hot path).
    wpack, bpack = prepare_packed_params(params)
    wpack, bpack = jax.block_until_ready((wpack, bpack))

    h1, h2, h3 = simplefc3_forward(x, wpack, bpack)
    jax.block_until_ready((h1, h2, h3))

    r1, r2, r3 = reference_forward(x, params)
    assert h1.shape == (B, 1) and h2.shape == (B, 1) and h3.shape == (B, 1)
    assert jnp.allclose(h1, r1, atol=1e-5)
    assert jnp.allclose(h2, r2, atol=1e-5)
    assert jnp.allclose(h3, r3, atol=1e-5)

    print("KERNEL_OK")
</pallas_src>

<mosaic_0001>
module attributes {stable_mosaic.version = 11 : i64} {
  func.func @simplefc3_kernel(%arg0: memref<2x32xf32, #tpu.memory_space<vmem>>, %arg1: memref<4x32x32xf32, #tpu.memory_space<vmem>>, %arg2: memref<4x1x32xf32, #tpu.memory_space<vmem>>, %arg3: memref<2x3xf32, #tpu.memory_space<vmem>>) attributes {dimension_semantics = [], scalar_prefetch = 0 : i64, scratch_operands = 0 : i64, tpu.core_type = #tpu.core_type<tc>} {
    %c0 = arith.constant 0 : index
    %c0_0 = arith.constant 0 : index
    %0 = vector.load %arg0[%c0, %c0_0] : memref<2x32xf32, #tpu.memory_space<vmem>>, vector<2x32xf32>
    %c0_1 = arith.constant 0 : index
    %c0_2 = arith.constant 0 : index
    %c0_3 = arith.constant 0 : index
    %1 = vector.load %arg1[%c0_1, %c0_2, %c0_3] : memref<4x32x32xf32, #tpu.memory_space<vmem>>, vector<1x32x32xf32>
    %2 = vector.shape_cast %1 : vector<1x32x32xf32> to vector<32x32xf32>
    %cst = arith.constant dense<0.000000e+00> : vector<2x32xf32>
    %3 = tpu.matmul %0, %2, %cst {dimension_numbers = #tpu.dot_dimension_numbers<[1], [0], [0], [1], [0, 0, 1, 1], [], []>} : vector<2x32xf32>, vector<32x32xf32>, vector<2x32xf32> -> vector<2x32xf32>
    %c0_4 = arith.constant 0 : index
    %c0_5 = arith.constant 0 : index
    %c0_6 = arith.constant 0 : index
    %4 = vector.load %arg2[%c0_4, %c0_5, %c0_6] : memref<4x1x32xf32, #tpu.memory_space<vmem>>, vector<1x1x32xf32>
    %5 = vector.shape_cast %4 : vector<1x1x32xf32> to vector<1x32xf32>
    %6 = vector.broadcast %5 : vector<1x32xf32> to vector<2x32xf32>
    %7 = arith.addf %3, %6 : vector<2x32xf32>
    %cst_7 = arith.constant 0.000000e+00 : f32
    %8 = vector.broadcast %cst_7 : f32 to vector<2x32xf32>
    %9 = arith.maximumf %7, %8 : vector<2x32xf32>
    %c1 = arith.constant 1 : index
    %c0_8 = arith.constant 0 : index
    %c0_9 = arith.constant 0 : index
    %10 = vector.load %arg1[%c1, %c0_8, %c0_9] : memref<4x32x32xf32, #tpu.memory_space<vmem>>, vector<1x32x32xf32>
    %11 = vector.shape_cast %10 : vector<1x32x32xf32> to vector<32x32xf32>
    %cst_10 = arith.constant dense<0.000000e+00> : vector<2x32xf32>
    %12 = tpu.matmul %9, %11, %cst_10 {dimension_numbers = #tpu.dot_dimension_numbers<[1], [0], [0], [1], [0, 0, 1, 1], [], []>} : vector<2x32xf32>, vector<32x32xf32>, vector<2x32xf32> -> vector<2x32xf32>
    %c1_11 = arith.constant 1 : index
    %c0_12 = arith.constant 0 : index
    %c0_13 = arith.constant 0 : index
    %13 = vector.load %arg2[%c1_11, %c0_12, %c0_13] : memref<4x1x32xf32, #tpu.memory_space<vmem>>, vector<1x1x32xf32>
    %14 = vector.shape_cast %13 : vector<1x1x32xf32> to vector<1x32xf32>
    %15 = vector.broadcast %14 : vector<1x32xf32> to vector<2x32xf32>
    %16 = arith.addf %12, %15 : vector<2x32xf32>
    %cst_14 = arith.constant 0.000000e+00 : f32
    %17 = vector.broadcast %cst_14 : f32 to vector<2x32xf32>
    %18 = arith.maximumf %16, %17 : vector<2x32xf32>
    %c2 = arith.constant 2 : index
    %c0_15 = arith.constant 0 : index
    %c0_16 = arith.constant 0 : index
    %19 = vector.load %arg1[%c2, %c0_15, %c0_16] : memref<4x32x32xf32, #tpu.memory_space<vmem>>, vector<1x32x32xf32>
    %20 = vector.shape_cast %19 : vector<1x32x32xf32> to vector<32x32xf32>
    %cst_17 = arith.constant dense<0.000000e+00> : vector<2x32xf32>
    %21 = tpu.matmul %18, %20, %cst_17 {dimension_numbers = #tpu.dot_dimension_numbers<[1], [0], [0], [1], [0, 0, 1, 1], [], []>} : vector<2x32xf32>, vector<32x32xf32>, vector<2x32xf32> -> vector<2x32xf32>
    %c2_18 = arith.constant 2 : index
    %c0_19 = arith.constant 0 : index
    %c0_20 = arith.constant 0 : index
    %22 = vector.load %arg2[%c2_18, %c0_19, %c0_20] : memref<4x1x32xf32, #tpu.memory_space<vmem>>, vector<1x1x32xf32>
    %23 = vector.shape_cast %22 : vector<1x1x32xf32> to vector<1x32xf32>
    %24 = vector.broadcast %23 : vector<1x32xf32> to vector<2x32xf32>
    %25 = arith.addf %21, %24 : vector<2x32xf32>
    %cst_21 = arith.constant 0.000000e+00 : f32
    %26 = vector.broadcast %cst_21 : f32 to vector<2x32xf32>
    %27 = arith.maximumf %25, %26 : vector<2x32xf32>
    %c3 = arith.constant 3 : index
    %c0_22 = arith.constant 0 : index
    %c0_23 = arith.constant 0 : index
    %28 = vector.load %arg1[%c3, %c0_22, %c0_23] : memref<4x32x32xf32, #tpu.memory_space<vmem>>, vector<1x32x32xf32>
    %29 = vector.shape_cast %28 : vector<1x32x32xf32> to vector<32x32xf32>
    %cst_24 = arith.constant dense<0.000000e+00> : vector<2x32xf32>
    %30 = tpu.matmul %27, %29, %cst_24 {dimension_numbers = #tpu.dot_dimension_numbers<[1], [0], [0], [1], [0, 0, 1, 1], [], []>} : vector<2x32xf32>, vector<32x32xf32>, vector<2x32xf32> -> vector<2x32xf32>
    %c3_25 = arith.constant 3 : index
    %c0_26 = arith.constant 0 : index
    %c0_27 = arith.constant 0 : index
    %31 = vector.load %arg2[%c3_25, %c0_26, %c0_27] : memref<4x1x32xf32, #tpu.memory_space<vmem>>, vector<1x1x32xf32>
    %32 = vector.shape_cast %31 : vector<1x1x32xf32> to vector<1x32xf32>
    %33 = vector.broadcast %32 : vector<1x32xf32> to vector<2x32xf32>
    %34 = arith.addf %30, %33 : vector<2x32xf32>
    %35 = vector.extract_strided_slice %34 {offsets = [0, 0], sizes = [2, 3], strides = [1, 1]} : vector<2x32xf32> to vector<2x3xf32>
    %c0_28 = arith.constant 0 : index
    %c0_29 = arith.constant 0 : index
    %36 = vector.load %arg3[%c0_28, %c0_29] : memref<2x3xf32, #tpu.memory_space<vmem>>, vector<2x3xf32>
    tpu.vector_store %arg3[%c0_28, %c0_29], %35 {strides = array<i32>} : memref<2x3xf32, #tpu.memory_space<vmem>>, vector<2x3xf32>,
    return
  }
}

</mosaic_0001>

<bundles_post_ra>
// kernel: simplefc3_forward.1
= control target key start
LH: loop header
LB: loop body
LE: loop exit
PB: predicated region body
PF: predicated region fallthrough
CT: control target
= control target key end

     0   :  { %8 = vsyncpa [#allocation3], 0  ;;  %s212_s15 = smov [#allocation2]   ;;  %s213_s17 = smov 128   ;;  %s260_s0 = inlined_call_operand.vmem [shape: f32[2,32], index: 0, kind: input, shape index: {}]   ;;  %s261_s1 = inlined_call_operand.hbm [shape: f32[4,32,32], index: 1, kind: input, shape index: {}]   ;;  %s262_s2 = inlined_call_operand.vmem [shape: f32[4,1,32], index: 2, kind: input, shape index: {}]   ;;  %s263_s3 = inlined_call_operand.vmem [shape: f32[2,3], index: 3, kind: output, shape index: {}]  }
   0x1   :  { %s15_s14 = sshll.u32 %s261_s1, 4  ;;  %s17_s16 = sshll.u32 %s212_s15, 4  ;;  %s16_s14 = int_to_ptr.hbm [resolvable:$true] %s15_s14  ;;  %s18_s16 = int_to_ptr.vmem [resolvable:$true] %s17_s16 }
   0x2   :  { %s214_s18 = smov 8  }
   0x3   :  { %23 = dma.hbm_to_vmem [thread:$0]  %s16_s14, 2048, %s18_s16, [#allocation3], %s213_s17, %s213_s17, %s214_s18  }
   0x4   :  { %210 = dma.done.wait [#allocation3], 2048  }
   0x5   :  { %211 = vsyncadd [#allocation3], 4294965248  ;;  %v34_v0 = vld [vmem:[#allocation2 + $0x18] sm:$0xff]  ;;  %v33_v1 = vld [vmem:[#allocation2 + $0x10] sm:$0xff]  ;;  %vm39_vm0 = vcmask 261120   ;;  %vm165_vm1 = vcmask 17408  }
   0x6   :  { %55 = vmatpush.msra.mxu0 %v34_v0  ;;  %v68_v2 = vld [vmem:[#allocation2 + $0x38] sm:$0xff]  ;;  %v32_v3 = vld [vmem:[#allocation2 + $0x8] sm:$0xff]  ;;  %v31_v4 = vld [vmem:[#allocation2] sm:$0xff] }
   0x7   :  { %89 = vmatpush.msra.mxu1 %v68_v2  ;;  %v30_v5 = vld [vmem:[%s260_s0] sm:$0x3]  ;;  %v67_v6 = vld [vmem:[#allocation2 + $0x30] sm:$0xff]  ;;  %v66_v7 = vld [vmem:[#allocation2 + $0x28] sm:$0xff] }
   0x8   :  { %56 = vmatpush.msra.mxu0 %v33_v1  ;;  %v65_v8 = vld [vmem:[#allocation2 + $0x20] sm:$0xff]  ;;  %v102_v9 = vld [vmem:[#allocation2 + $0x58] sm:$0xff]  ;;  %v101_v14 = vld [vmem:[#allocation2 + $0x50] sm:$0xff] }
   0x9   :  { %90 = vmatpush.msra.mxu1 %v67_v6  ;;  %123 = vmatpush.msra.mxu2 %v102_v9  ;;  %v182_v10 = vld [vmem:[%s262_s2] ss:$0 sm:$0xff]  ;;  %v100_v15 = vld [vmem:[#allocation2 + $0x48] sm:$0xff]  ;;  %v136_v17 = vld [vmem:[#allocation2 + $0x78] sm:$0xff] }
   0xa   :  { %57 = vmatpush.msra.mxu0 %v32_v3  ;;  %v99_v16 = vld [vmem:[#allocation2 + $0x40] sm:$0xff]  ;;  %157 = vmatpush.msra.mxu3 %v136_v17  ;;  %v135_v22 = vld [vmem:[#allocation2 + $0x70] sm:$0xff]  ;;  %v134_v23 = vld [vmem:[#allocation2 + $0x68] sm:$0xff] }
   0xb   :  { %91 = vmatpush.msra.mxu1 %v66_v7  ;;  %124 = vmatpush.msra.mxu2 %v101_v14  ;;  %v183_v18 = vld [vmem:[%s262_s2 + $0x1] ss:$0 sm:$0xff]  ;;  %v184_v25 = vld [vmem:[%s262_s2 + $0x2] ss:$0 sm:$0xff]  ;;  %v185_v29 = vld [vmem:[%s262_s2 + $0x3] ss:$0 sm:$0xff] }
   0xc   :  { %58 = vmatpush.msra.mxu0 %v31_v4  ;;  %158 = vmatpush.msra.mxu3 %v135_v22  ;;  %v133_v24 = vld [vmem:[#allocation2 + $0x60] sm:$0xff] }
   0xd   :  { %172 = vmatmul.msk.f32.vlgmr.msra.gmra.mxu0 %vm39_vm0, %v30_v5  ;;  %92 = vmatpush.msra.mxu1 %v65_v8 }
   0xe   :  { %125 = vmatpush.msra.mxu2 %v100_v15  ;;  %159 = vmatpush.msra.mxu3 %v134_v23 }
  0x10   :  { %126 = vmatpush.msra.mxu2 %v99_v16  ;;  %160 = vmatpush.msra.mxu3 %v133_v24 }
  0x8a   :  { %v60_v11 = vpop.f32.mrf.mxu0 }
  0x8b   :  { %v61_v12 = vadd.f32 %v182_v10, %v60_v11 }
  0x8d   :  { %v63_v13 = vmax.f32 %v61_v12, 0.0 }
  0x8f   :  { %174 = vmatmul.msk.f32.vlgmr.msra.gmra.mxu1 %vm39_vm0, %v63_v13 }
 0x10c   :  { %v94_v19 = vpop.f32.mrf.mxu1 }
 0x10d   :  { %v95_v20 = vadd.f32 %v183_v18, %v94_v19 }
 0x10f   :  { %v97_v21 = vmax.f32 %v95_v20, 0.0 }
 0x111   :  { %176 = vmatmul.msk.f32.vlgmr.msra.gmra.mxu2 %vm39_vm0, %v97_v21 }
 0x194   :  { %v128_v26 = vpop.f32.mrf.mxu2 }
 0x195   :  { %v129_v27 = vadd.f32 %v184_v25, %v128_v26 }
 0x197   :  { %v131_v28 = vmax.f32 %v129_v27, 0.0 }
 0x199   :  { %178 = vmatmul.msk.f32.vlgmr.msra.gmra.mxu3 %vm39_vm0, %v131_v28 }
 0x21c   :  { %v162_v30 = vpop.f32.mrf.mxu3 }
 0x21d   :  { %v163_v31 = vadd.f32 %v185_v29, %v162_v30 }
 0x21f   :  { %166 = vst.msk [vmem:[%s263_s3] sm:$0x3] %vm165_vm1, %v163_v31 }
 0x220   :  { %171 = vsyncpa [#allocation3], 1 }

</bundles_post_ra>
